<compile_context>
chip_gen: v7x
topology: tpu7x:2x2x1
jax: 0.10.0
libtpu: 0.0.40
codegen_flags: <defaults>
</compile_context>

<pallas_src>
import jax
import jax.numpy as jnp
from jax.experimental import pallas as pl
from jax.experimental.pallas import tpu as pltpu


def _round_up(x, m):
    return ((x + m - 1) // m) * m


def conv3x3_relu(x, weight, bias, *, vmem_budget_bytes=8 << 20):
    """ConvRelu forward: Conv2d(k=3, stride=1, padding=1) + ReLU.

    x:      (N, C_in, H, W)  float32, NCHW (PyTorch layout)
    weight: (C_out, C_in, 3, 3) float32 (PyTorch OIHW layout)
    bias:   (C_out,) float32
    returns (N, C_out, H, W) float32
    """
    N, C_in, H, W = x.shape
    C_out = weight.shape[0]
    # TODO(synk): only the module's Conv3X3 case (3x3, stride=1, dilation=1, pad=1) is handled.

    Hp, Wp = H + 2, W + 2                     # 1-px zero halo (padding=1)
    Lpad = Hp * Wp                            # padded-frame flattened length
    OFF = Wp + 1                              # max |negative tap shift|
    LOUT = _round_up(Lpad, 128)               # lane-dense compute/store width
    LEXT = _round_up(OFF + (Wp + 1) + LOUT, 128)   # extended input lane length
    C8 = _round_up(C_in, 8)                   # sublane-pad input channels
    CO8 = _round_up(C_out, 8)                 # sublane-pad output channels
    R = 9                                     # 3x3 taps
    # Tap shift in the flattened padded frame for kernel offset (dy, dx).
    shifts = [(dy - 1) * Wp + (dx - 1) for dy in range(3) for dx in range(3)]

    # Batch tile: NB images per grid step (fewer grid steps, wider MXU matmul),
    # capped by a VMEM budget (im2col scratch + double-buffered in/out blocks).
    per_img_bytes = 4 * (R * C8 * LOUT        # im2col slab (scratch, single copy)
                         + 2 * C8 * LEXT      # double-buffered input block
                         + 2 * CO8 * LOUT)    # double-buffered output block
    NB = int(max(1, min(N, vmem_budget_bytes // max(per_img_bytes, 1))))
    NG = (N + NB - 1) // NB                   # grid steps over batch
    Npad = NG * NB

    # ---------------- glue: layout plumbing only (no compute) ----------------
    # pad batch to Npad, zero-pad channels to C8, add the 1-px spatial halo,
    # flatten, and place the padded frame at offset OFF inside a zero
    # "extended" lane buffer so every tap shift is a static in-bounds lane
    # slice inside the kernel.
    xp = jnp.pad(x.astype(jnp.float32),
                 ((0, Npad - N), (0, C8 - C_in), (1, 1), (1, 1)))      # (Npad, C8, Hp, Wp)
    x_ext = jnp.zeros((Npad, C8, LEXT), jnp.float32)
    x_ext = x_ext.at[:, :, OFF:OFF + Lpad].set(xp.reshape(Npad, C8, Lpad))

    # Stack the 9 per-tap (C_out, C_in) matrices into one (CO8, R*C8) matrix so
    # the whole conv is a single MXU matmul against the in-kernel im2col slab.
    wpd = jnp.pad(weight.astype(jnp.float32),
                  ((0, CO8 - C_out), (0, C8 - C_in), (0, 0), (0, 0)))  # (CO8, C8, 3, 3)
    w_flat = jnp.transpose(wpd, (0, 2, 3, 1)).reshape(CO8, R * C8)     # tap-major, ch-minor
    b_col = jnp.pad(bias.astype(jnp.float32), (0, CO8 - C_out)).reshape(CO8, 1)

    # ------------------------------- kernel ----------------------------------
    def kernel(x_ref, w_ref, b_ref, o_ref, col_ref):
        # Build the 9-tap im2col slab in VMEM from lane-shifted views of the
        # padded input, for all NB images of this grid step (no HBM im2col;
        # shifts ride the load/XLU path).  All slab writes are (8,128) aligned.
        for b in range(NB):
            for r in range(R):
                s = OFF + shifts[r]                       # static, >= 0
                col_ref[r * C8:(r + 1) * C8, b * LOUT:(b + 1) * LOUT] = \
                    x_ref[b, :, s:s + LOUT]
        # Single MXU contraction over (taps x channels), then bias + ReLU (VPU).
        y = jnp.dot(w_ref[...], col_ref[...], preferred_element_type=jnp.float32)
        y = jnp.maximum(y + b_ref[...], 0.0)
        # Lane-dense, unmasked stores (LOUT is a multiple of 128).
        for b in range(NB):
            o_ref[b] = y[:, b * LOUT:(b + 1) * LOUT]

    out_ext = pl.pallas_call(
        kernel,
        grid=(NG,),
        in_specs=[
            pl.BlockSpec((NB, C8, LEXT), lambda g: (g, 0, 0)),    # extended input
            pl.BlockSpec((CO8, R * C8), lambda g: (0, 0)),        # stacked tap weights (resident)
            pl.BlockSpec((CO8, 1), lambda g: (0, 0)),             # bias column (resident)
        ],
        out_specs=pl.BlockSpec((NB, CO8, LOUT), lambda g: (g, 0, 0)),
        out_shape=jax.ShapeDtypeStruct((Npad, CO8, LOUT), jnp.float32),
        scratch_shapes=[pltpu.VMEM((R * C8, NB * LOUT), jnp.float32)],   # im2col slab
        compiler_params=pltpu.CompilerParams(dimension_semantics=("parallel",)),
    )(x_ext, w_flat, b_col)

    # ---- glue: drop batch/channel/lane padding, extract the frame interior ----
    out = out_ext[:N, :C_out, :Lpad].reshape(N, C_out, Hp, Wp)
    return out[:, :, 1:H + 1, 1:W + 1]


# ------------------------------ reference -----------------------------------
def reference(x, weight, bias):
    """Pure-JAX ConvRelu (Conv2d 3x3, padding=1, stride=1, then ReLU)."""
    y = jax.lax.conv_general_dilated(
        x.astype(jnp.float32), weight.astype(jnp.float32),
        window_strides=(1, 1), padding=((1, 1), (1, 1)),
        dimension_numbers=("NCHW", "OIHW", "NCHW"))
    return jnp.maximum(y + bias[None, :, None, None], 0.0)


# --------------------------------- main --------------------------------------
if __name__ == "__main__":
    key = jax.random.PRNGKey(0)
    kx, kw, kb = jax.random.split(key, 3)

    N, C_in, C_out, H, W = 2, 4, 16, 16, 16
    x = jax.random.normal(kx, (N, C_in, H, W), jnp.float32)
    weight = 0.3 * jax.random.normal(kw, (C_out, C_in, 3, 3), jnp.float32)
    bias = 0.1 * jax.random.normal(kb, (C_out,), jnp.float32)

    out = jax.block_until_ready(conv3x3_relu(x, weight, bias))
    ref = jax.block_until_ready(reference(x, weight, bias))

    assert out.shape == (N, C_out, H, W), out.shape
    err = float(jnp.max(jnp.abs(out - ref)))
    scale = float(jnp.max(jnp.abs(ref))) + 1.0
    assert err < 5e-2 * scale, (err, scale)
    print("KERNEL_OK")
</pallas_src>

<mosaic_0001>
module attributes {stable_mosaic.version = 11 : i64} {
  func.func @kernel(%arg0: i32, %arg1: memref<2x8x512xf32, #tpu.memory_space<vmem>>, %arg2: memref<16x72xf32, #tpu.memory_space<vmem>>, %arg3: memref<16x1xf32, #tpu.memory_space<vmem>>, %arg4: memref<2x16x384xf32, #tpu.memory_space<vmem>>, %arg5: memref<72x768xf32, #tpu.memory_space<vmem>>) attributes {dimension_semantics = [#tpu.dimension_semantics<parallel>], iteration_bounds = array<i64: 1>, scalar_prefetch = 0 : i64, scratch_operands = 1 : i64, tpu.core_type = #tpu.core_type<tc>, window_params = [{transform_indices = @transform_0, window_bounds = array<i64: 2, 8, 512>}, {pipeline_mode = #tpu.pipeline_mode<synchronous>, transform_indices = @transform_1, window_bounds = array<i64: 16, 72>}, {pipeline_mode = #tpu.pipeline_mode<synchronous>, transform_indices = @transform_2, window_bounds = array<i64: 16, 1>}, {transform_indices = @transform_3, window_bounds = array<i64: 2, 16, 384>}]} {
    %c0 = arith.constant 0 : index
    %c0_0 = arith.constant 0 : index
    %c0_1 = arith.constant 0 : index
    %0 = vector.load %arg1[%c0, %c0_0, %c0_1] : memref<2x8x512xf32, #tpu.memory_space<vmem>>, vector<1x8x384xf32>
    %1 = vector.shape_cast %0 : vector<1x8x384xf32> to vector<8x384xf32>
    %c0_2 = arith.constant 0 : index
    %c0_3 = arith.constant 0 : index
    %2 = vector.load %arg5[%c0_2, %c0_3] : memref<72x768xf32, #tpu.memory_space<vmem>>, vector<8x384xf32>
    tpu.vector_store %arg5[%c0_2, %c0_3], %1 {strides = array<i32>} : memref<72x768xf32, #tpu.memory_space<vmem>>, vector<8x384xf32>,
    %c0_4 = arith.constant 0 : index
    %c0_5 = arith.constant 0 : index
    %c1 = arith.constant 1 : index
    %3 = vector.load %arg1[%c0_4, %c0_5, %c1] : memref<2x8x512xf32, #tpu.memory_space<vmem>>, vector<1x8x384xf32>
    %4 = vector.shape_cast %3 : vector<1x8x384xf32> to vector<8x384xf32>
    %c8 = arith.constant 8 : index
    %c0_6 = arith.constant 0 : index
    %5 = vector.load %arg5[%c8, %c0_6] : memref<72x768xf32, #tpu.memory_space<vmem>>, vector<8x384xf32>
    tpu.vector_store %arg5[%c8, %c0_6], %4 {strides = array<i32>} : memref<72x768xf32, #tpu.memory_space<vmem>>, vector<8x384xf32>,
    %c0_7 = arith.constant 0 : index
    %c0_8 = arith.constant 0 : index
    %c2 = arith.constant 2 : index
    %6 = vector.load %arg1[%c0_7, %c0_8, %c2] : memref<2x8x512xf32, #tpu.memory_space<vmem>>, vector<1x8x384xf32>
    %7 = vector.shape_cast %6 : vector<1x8x384xf32> to vector<8x384xf32>
    %c16 = arith.constant 16 : index
    %c0_9 = arith.constant 0 : index
    %8 = vector.load %arg5[%c16, %c0_9] : memref<72x768xf32, #tpu.memory_space<vmem>>, vector<8x384xf32>
    tpu.vector_store %arg5[%c16, %c0_9], %7 {strides = array<i32>} : memref<72x768xf32, #tpu.memory_space<vmem>>, vector<8x384xf32>,
    %c0_10 = arith.constant 0 : index
    %c0_11 = arith.constant 0 : index
    %c18 = arith.constant 18 : index
    %9 = vector.load %arg1[%c0_10, %c0_11, %c18] : memref<2x8x512xf32, #tpu.memory_space<vmem>>, vector<1x8x384xf32>
    %10 = vector.shape_cast %9 : vector<1x8x384xf32> to vector<8x384xf32>
    %c24 = arith.constant 24 : index
    %c0_12 = arith.constant 0 : index
    %11 = vector.load %arg5[%c24, %c0_12] : memref<72x768xf32, #tpu.memory_space<vmem>>, vector<8x384xf32>
    tpu.vector_store %arg5[%c24, %c0_12], %10 {strides = array<i32>} : memref<72x768xf32, #tpu.memory_space<vmem>>, vector<8x384xf32>,
    %c0_13 = arith.constant 0 : index
    %c0_14 = arith.constant 0 : index
    %c19 = arith.constant 19 : index
    %12 = vector.load %arg1[%c0_13, %c0_14, %c19] : memref<2x8x512xf32, #tpu.memory_space<vmem>>, vector<1x8x384xf32>
    %13 = vector.shape_cast %12 : vector<1x8x384xf32> to vector<8x384xf32>
    %c32 = arith.constant 32 : index
    %c0_15 = arith.constant 0 : index
    %14 = vector.load %arg5[%c32, %c0_15] : memref<72x768xf32, #tpu.memory_space<vmem>>, vector<8x384xf32>
    tpu.vector_store %arg5[%c32, %c0_15], %13 {strides = array<i32>} : memref<72x768xf32, #tpu.memory_space<vmem>>, vector<8x384xf32>,
    %c0_16 = arith.constant 0 : index
    %c0_17 = arith.constant 0 : index
    %c20 = arith.constant 20 : index
    %15 = vector.load %arg1[%c0_16, %c0_17, %c20] : memref<2x8x512xf32, #tpu.memory_space<vmem>>, vector<1x8x384xf32>
    %16 = vector.shape_cast %15 : vector<1x8x384xf32> to vector<8x384xf32>
    %c40 = arith.constant 40 : index
    %c0_18 = arith.constant 0 : index
    %17 = vector.load %arg5[%c40, %c0_18] : memref<72x768xf32, #tpu.memory_space<vmem>>, vector<8x384xf32>
    tpu.vector_store %arg5[%c40, %c0_18], %16 {strides = array<i32>} : memref<72x768xf32, #tpu.memory_space<vmem>>, vector<8x384xf32>,
    %c0_19 = arith.constant 0 : index
    %c0_20 = arith.constant 0 : index
    %c36 = arith.constant 36 : index
    %18 = vector.load %arg1[%c0_19, %c0_20, %c36] : memref<2x8x512xf32, #tpu.memory_space<vmem>>, vector<1x8x384xf32>
    %19 = vector.shape_cast %18 : vector<1x8x384xf32> to vector<8x384xf32>
    %c48 = arith.constant 48 : index
    %c0_21 = arith.constant 0 : index
    %20 = vector.load %arg5[%c48, %c0_21] : memref<72x768xf32, #tpu.memory_space<vmem>>, vector<8x384xf32>
    tpu.vector_store %arg5[%c48, %c0_21], %19 {strides = array<i32>} : memref<72x768xf32, #tpu.memory_space<vmem>>, vector<8x384xf32>,
    %c0_22 = arith.constant 0 : index
    %c0_23 = arith.constant 0 : index
    %c37 = arith.constant 37 : index
    %21 = vector.load %arg1[%c0_22, %c0_23, %c37] : memref<2x8x512xf32, #tpu.memory_space<vmem>>, vector<1x8x384xf32>
    %22 = vector.shape_cast %21 : vector<1x8x384xf32> to vector<8x384xf32>
    %c56 = arith.constant 56 : index
    %c0_24 = arith.constant 0 : index
    %23 = vector.load %arg5[%c56, %c0_24] : memref<72x768xf32, #tpu.memory_space<vmem>>, vector<8x384xf32>
    tpu.vector_store %arg5[%c56, %c0_24], %22 {strides = array<i32>} : memref<72x768xf32, #tpu.memory_space<vmem>>, vector<8x384xf32>,
    %c0_25 = arith.constant 0 : index
    %c0_26 = arith.constant 0 : index
    %c38 = arith.constant 38 : index
    %24 = vector.load %arg1[%c0_25, %c0_26, %c38] : memref<2x8x512xf32, #tpu.memory_space<vmem>>, vector<1x8x384xf32>
    %25 = vector.shape_cast %24 : vector<1x8x384xf32> to vector<8x384xf32>
    %c64 = arith.constant 64 : index
    %c0_27 = arith.constant 0 : index
    %26 = vector.load %arg5[%c64, %c0_27] : memref<72x768xf32, #tpu.memory_space<vmem>>, vector<8x384xf32>
    tpu.vector_store %arg5[%c64, %c0_27], %25 {strides = array<i32>} : memref<72x768xf32, #tpu.memory_space<vmem>>, vector<8x384xf32>,
    %c1_28 = arith.constant 1 : index
    %c0_29 = arith.constant 0 : index
    %c0_30 = arith.constant 0 : index
    %27 = vector.load %arg1[%c1_28, %c0_29, %c0_30] : memref<2x8x512xf32, #tpu.memory_space<vmem>>, vector<1x8x384xf32>
    %28 = vector.shape_cast %27 : vector<1x8x384xf32> to vector<8x384xf32>
    %c0_31 = arith.constant 0 : index
    %c384 = arith.constant 384 : index
    %29 = vector.load %arg5[%c0_31, %c384] : memref<72x768xf32, #tpu.memory_space<vmem>>, vector<8x384xf32>
    tpu.vector_store %arg5[%c0_31, %c384], %28 {strides = array<i32>} : memref<72x768xf32, #tpu.memory_space<vmem>>, vector<8x384xf32>,
    %c1_32 = arith.constant 1 : index
    %c0_33 = arith.constant 0 : index
    %c1_34 = arith.constant 1 : index
    %30 = vector.load %arg1[%c1_32, %c0_33, %c1_34] : memref<2x8x512xf32, #tpu.memory_space<vmem>>, vector<1x8x384xf32>
    %31 = vector.shape_cast %30 : vector<1x8x384xf32> to vector<8x384xf32>
    %c8_35 = arith.constant 8 : index
    %c384_36 = arith.constant 384 : index
    %32 = vector.load %arg5[%c8_35, %c384_36] : memref<72x768xf32, #tpu.memory_space<vmem>>, vector<8x384xf32>
    tpu.vector_store %arg5[%c8_35, %c384_36], %31 {strides = array<i32>} : memref<72x768xf32, #tpu.memory_space<vmem>>, vector<8x384xf32>,
    %c1_37 = arith.constant 1 : index
    %c0_38 = arith.constant 0 : index
    %c2_39 = arith.constant 2 : index
    %33 = vector.load %arg1[%c1_37, %c0_38, %c2_39] : memref<2x8x512xf32, #tpu.memory_space<vmem>>, vector<1x8x384xf32>
    %34 = vector.shape_cast %33 : vector<1x8x384xf32> to vector<8x384xf32>
    %c16_40 = arith.constant 16 : index
    %c384_41 = arith.constant 384 : index
    %35 = vector.load %arg5[%c16_40, %c384_41] : memref<72x768xf32, #tpu.memory_space<vmem>>, vector<8x384xf32>
    tpu.vector_store %arg5[%c16_40, %c384_41], %34 {strides = array<i32>} : memref<72x768xf32, #tpu.memory_space<vmem>>, vector<8x384xf32>,
    %c1_42 = arith.constant 1 : index
    %c0_43 = arith.constant 0 : index
    %c18_44 = arith.constant 18 : index
    %36 = vector.load %arg1[%c1_42, %c0_43, %c18_44] : memref<2x8x512xf32, #tpu.memory_space<vmem>>, vector<1x8x384xf32>
    %37 = vector.shape_cast %36 : vector<1x8x384xf32> to vector<8x384xf32>
    %c24_45 = arith.constant 24 : index
    %c384_46 = arith.constant 384 : index
    %38 = vector.load %arg5[%c24_45, %c384_46] : memref<72x768xf32, #tpu.memory_space<vmem>>, vector<8x384xf32>
    tpu.vector_store %arg5[%c24_45, %c384_46], %37 {strides = array<i32>} : memref<72x768xf32, #tpu.memory_space<vmem>>, vector<8x384xf32>,
    %c1_47 = arith.constant 1 : index
    %c0_48 = arith.constant 0 : index
    %c19_49 = arith.constant 19 : index
    %39 = vector.load %arg1[%c1_47, %c0_48, %c19_49] : memref<2x8x512xf32, #tpu.memory_space<vmem>>, vector<1x8x384xf32>
    %40 = vector.shape_cast %39 : vector<1x8x384xf32> to vector<8x384xf32>
    %c32_50 = arith.constant 32 : index
    %c384_51 = arith.constant 384 : index
    %41 = vector.load %arg5[%c32_50, %c384_51] : memref<72x768xf32, #tpu.memory_space<vmem>>, vector<8x384xf32>
    tpu.vector_store %arg5[%c32_50, %c384_51], %40 {strides = array<i32>} : memref<72x768xf32, #tpu.memory_space<vmem>>, vector<8x384xf32>,
    %c1_52 = arith.constant 1 : index
    %c0_53 = arith.constant 0 : index
    %c20_54 = arith.constant 20 : index
    %42 = vector.load %arg1[%c1_52, %c0_53, %c20_54] : memref<2x8x512xf32, #tpu.memory_space<vmem>>, vector<1x8x384xf32>
    %43 = vector.shape_cast %42 : vector<1x8x384xf32> to vector<8x384xf32>
    %c40_55 = arith.constant 40 : index
    %c384_56 = arith.constant 384 : index
    %44 = vector.load %arg5[%c40_55, %c384_56] : memref<72x768xf32, #tpu.memory_space<vmem>>, vector<8x384xf32>
    tpu.vector_store %arg5[%c40_55, %c384_56], %43 {strides = array<i32>} : memref<72x768xf32, #tpu.memory_space<vmem>>, vector<8x384xf32>,
    %c1_57 = arith.constant 1 : index
    %c0_58 = arith.constant 0 : index
    %c36_59 = arith.constant 36 : index
    %45 = vector.load %arg1[%c1_57, %c0_58, %c36_59] : memref<2x8x512xf32, #tpu.memory_space<vmem>>, vector<1x8x384xf32>
    %46 = vector.shape_cast %45 : vector<1x8x384xf32> to vector<8x384xf32>
    %c48_60 = arith.constant 48 : index
    %c384_61 = arith.constant 384 : index
    %47 = vector.load %arg5[%c48_60, %c384_61] : memref<72x768xf32, #tpu.memory_space<vmem>>, vector<8x384xf32>
    tpu.vector_store %arg5[%c48_60, %c384_61], %46 {strides = array<i32>} : memref<72x768xf32, #tpu.memory_space<vmem>>, vector<8x384xf32>,
    %c1_62 = arith.constant 1 : index
    %c0_63 = arith.constant 0 : index
    %c37_64 = arith.constant 37 : index
    %48 = vector.load %arg1[%c1_62, %c0_63, %c37_64] : memref<2x8x512xf32, #tpu.memory_space<vmem>>, vector<1x8x384xf32>
    %49 = vector.shape_cast %48 : vector<1x8x384xf32> to vector<8x384xf32>
    %c56_65 = arith.constant 56 : index
    %c384_66 = arith.constant 384 : index
    %50 = vector.load %arg5[%c56_65, %c384_66] : memref<72x768xf32, #tpu.memory_space<vmem>>, vector<8x384xf32>
    tpu.vector_store %arg5[%c56_65, %c384_66], %49 {strides = array<i32>} : memref<72x768xf32, #tpu.memory_space<vmem>>, vector<8x384xf32>,
    %c1_67 = arith.constant 1 : index
    %c0_68 = arith.constant 0 : index
    %c38_69 = arith.constant 38 : index
    %51 = vector.load %arg1[%c1_67, %c0_68, %c38_69] : memref<2x8x512xf32, #tpu.memory_space<vmem>>, vector<1x8x384xf32>
    %52 = vector.shape_cast %51 : vector<1x8x384xf32> to vector<8x384xf32>
    %c64_70 = arith.constant 64 : index
    %c384_71 = arith.constant 384 : index
    %53 = vector.load %arg5[%c64_70, %c384_71] : memref<72x768xf32, #tpu.memory_space<vmem>>, vector<8x384xf32>
    tpu.vector_store %arg5[%c64_70, %c384_71], %52 {strides = array<i32>} : memref<72x768xf32, #tpu.memory_space<vmem>>, vector<8x384xf32>,
    %c0_72 = arith.constant 0 : index
    %c0_73 = arith.constant 0 : index
    %54 = vector.load %arg2[%c0_72, %c0_73] : memref<16x72xf32, #tpu.memory_space<vmem>>, vector<16x72xf32>
    %c0_74 = arith.constant 0 : index
    %c0_75 = arith.constant 0 : index
    %55 = vector.load %arg5[%c0_74, %c0_75] : memref<72x768xf32, #tpu.memory_space<vmem>>, vector<72x768xf32>
    %cst = arith.constant dense<0.000000e+00> : vector<16x768xf32>
    %56 = tpu.matmul %54, %55, %cst {dimension_numbers = #tpu.dot_dimension_numbers<[1], [0], [0], [1], [0, 0, 1, 1], [], []>} : vector<16x72xf32>, vector<72x768xf32>, vector<16x768xf32> -> vector<16x768xf32>
    %c0_76 = arith.constant 0 : index
    %c0_77 = arith.constant 0 : index
    %57 = vector.load %arg3[%c0_76, %c0_77] : memref<16x1xf32, #tpu.memory_space<vmem>>, vector<16x1xf32>
    %58 = vector.broadcast %57 : vector<16x1xf32> to vector<16x768xf32>
    %59 = arith.addf %56, %58 : vector<16x768xf32>
    %cst_78 = arith.constant 0.000000e+00 : f32
    %60 = vector.broadcast %cst_78 : f32 to vector<16x768xf32>
    %61 = arith.maximumf %59, %60 : vector<16x768xf32>
    %62 = vector.extract_strided_slice %61 {offsets = [0, 0], sizes = [16, 384], strides = [1, 1]} : vector<16x768xf32> to vector<16x384xf32>
    %c0_79 = arith.constant 0 : index
    %c0_80 = arith.constant 0 : index
    %c0_81 = arith.constant 0 : index
    %63 = vector.load %arg4[%c0_79, %c0_80, %c0_81] : memref<2x16x384xf32, #tpu.memory_space<vmem>>, vector<1x16x384xf32>
    %64 = vector.shape_cast %63 : vector<1x16x384xf32> to vector<16x384xf32>
    %65 = vector.shape_cast %62 : vector<16x384xf32> to vector<1x16x384xf32>
    tpu.vector_store %arg4[%c0_79, %c0_80, %c0_81], %65 {strides = array<i32>} : memref<2x16x384xf32, #tpu.memory_space<vmem>>, vector<1x16x384xf32>,
    %66 = vector.extract_strided_slice %61 {offsets = [0, 384], sizes = [16, 384], strides = [1, 1]} : vector<16x768xf32> to vector<16x384xf32>
    %c1_82 = arith.constant 1 : index
    %c0_83 = arith.constant 0 : index
    %c0_84 = arith.constant 0 : index
    %67 = vector.load %arg4[%c1_82, %c0_83, %c0_84] : memref<2x16x384xf32, #tpu.memory_space<vmem>>, vector<1x16x384xf32>
    %68 = vector.shape_cast %67 : vector<1x16x384xf32> to vector<16x384xf32>
    %69 = vector.shape_cast %66 : vector<16x384xf32> to vector<1x16x384xf32>
    tpu.vector_store %arg4[%c1_82, %c0_83, %c0_84], %69 {strides = array<i32>} : memref<2x16x384xf32, #tpu.memory_space<vmem>>, vector<1x16x384xf32>,
    return
  }
  func.func @transform_0(%arg0: i32) -> (i32, i32, i32) {
    %c0_i32 = arith.constant 0 : i32
    %c0_i32_0 = arith.constant 0 : i32
    %c0_i32_1 = arith.constant 0 : i32
    return %arg0, %c0_i32, %c0_i32_0 : i32, i32, i32
  }
  func.func @transform_1(%arg0: i32) -> (i32, i32) {
    %c0_i32 = arith.constant 0 : i32
    %c0_i32_0 = arith.constant 0 : i32
    %c0_i32_1 = arith.constant 0 : i32
    return %c0_i32, %c0_i32_0 : i32, i32
  }
  func.func @transform_2(%arg0: i32) -> (i32, i32) {
    %c0_i32 = arith.constant 0 : i32
    %c0_i32_0 = arith.constant 0 : i32
    %c0_i32_1 = arith.constant 0 : i32
    return %c0_i32, %c0_i32_0 : i32, i32
  }
  func.func @transform_3(%arg0: i32) -> (i32, i32, i32) {
    %c0_i32 = arith.constant 0 : i32
    %c0_i32_0 = arith.constant 0 : i32
    %c0_i32_1 = arith.constant 0 : i32
    return %arg0, %c0_i32, %c0_i32_0 : i32, i32, i32
  }
}

</mosaic_0001>

<bundles_post_ra>
// kernel: tpu_custom_call.1
= control target key start
LH: loop header
LB: loop body
LE: loop exit
PB: predicated region body
PF: predicated region fallthrough
CT: control target
= control target key end

     0   :  { %8 = vsyncpa [#allocation4], 0  ;;  %s1315_s0 = inlined_call_operand.hbm [shape: f32[2,8,512], index: 0, kind: input, shape index: {}]   ;;  %s1316_s1 = inlined_call_operand.vmem [shape: f32[16,72], index: 1, kind: input, shape index: {}]   ;;  %s1317_s2 = inlined_call_operand.vmem [shape: f32[16,1], index: 2, kind: input, shape index: {}]   ;;  %s1318_s3 = inlined_call_operand.hbm [shape: f32[2,16,384], index: 3, kind: output, shape index: {}]  }
   0x1   :  { %9 = vsyncpa [#allocation5], 0  ;;  %s1068_s12 = smov [#allocation3]   ;;  %s1020_s16 = scalar_lea.hbm %s1315_s0, 1024 }
   0x2   :  { %s15_s13 = sshll.u32 %s1068_s12, 4  ;;  %p1021_p0 = scmp.ne.s32.totalorder %s1315_s0, %s1020_s16  ;;  %s16_s13 = int_to_ptr.vmem [resolvable:$true] %s15_s13 }
   0x3   :  { %p1024_p1 = scmp.lt.u32.totalorder %s1020_s16, %s1315_s0 }
   0x5   :  { %p1026_p2 = pnand %p1024_p1, %p1021_p0 }
   0x7   :  { %1029 = shalt.err (!%p1026_p2)
}
   0x8   :  { %s1030_s21 = scalar_lea.vmem %s16_s13, 1024  ;;  %p1035_p4 = scmp.lt.s32.totalorder %s16_s13, %s16_s13 }
   0x9   :  { %p1031_p3 = scmp.ne.s32.totalorder %s16_s13, %s1030_s21  ;;  %p1036_p5 = scmp.lt.s32.totalorder %s1030_s21, %s1030_s21 }
   0xb   :  { %p1037_p6 = por %p1036_p5, %p1035_p4 }
   0xd   :  { %p1038_p7 = pnand %p1037_p6, %p1031_p3 }
   0xf   :  { %1041 = shalt.err (!%p1038_p7)
}
  0x10   :  { %s1069_s22 = smov 512   ;;  %s1070_s23 = smov 32  }
  0x11   :  { %21 = dma.hbm_to_vmem [thread:$0]  %s1315_s0, 1024, %s16_s13, [#allocation4], %s1069_s22, %s1069_s22, %s1070_s23  }
  0x12   :  { %1064 = dma.done.wait [#allocation4], 1024  }
  0x13   :  { %1065 = vsyncadd [#allocation4], 4294966272  ;;  %v1116_v0 = vld [vmem:[#allocation3 + $0x8] sm:$0xff]  ;;  %v1118_v1 = vld [vmem:[#allocation3 + $0x10] sm:$0xff]  ;;  %s1071_s26 = smov 127   ;;  %s1072_s0 = smov 126  }
  0x14   :  { %v1120_v2 = vld [vmem:[#allocation3] sm:$0xff]  ;;  %v878_v3 = vpack.i.bf16 %v1118_v1, %v1116_v0  ;;  %v38_v4 = vld [vmem:[#allocation3 + $0x18] sm:$0xff]  ;;  %v1126_v6 = vld [vmem:[#allocation3 + $0x28] sm:$0xff]  ;;  %s1073_s27 = smov 110   ;;  %s1074_s28 = smov 109   ;;  %v1079_v12 = vmov 0.0  }
  0x15   :  { %v1124_v5 = vld [vmem:[#allocation3 + $0x20] sm:$0xff]  ;;  %v888_v7 = vpack.i.bf16 %v38_v4, %v1120_v2  ;;  %s1075_s29 = smov 108   ;;  %s1076_s30 = smov 92   ;;  %v1146_v9 = vld [vmem:[#allocation3 + $0x30] sm:$0xff]  ;;  %v253_v10 = vld [vmem:[#allocation3 + $0x38] sm:$0xff]  ;;  %589 = vmatprep.mubr.f32.mxu0 %v1079_v12  ;;  %666 = vmatprep.mubr.f32.mxu1 %v1079_v12  ;;  %v1080_v13 = vmov 0  }
  0x16   :  { %879 = vrot.lane.b32.xlu0 %v878_v3, %s1071_s26  ;;  %v883_v8 = vpack.i.bf16 %v1126_v6, %v1124_v5  ;;  %s1077_s4 = smov 91   ;;  %s1078_s5 = smov 90   ;;  %v983_v11 = vpack.i.bf16 %v253_v10, %v1146_v9  ;;  %1019 = vset.pattern.permute.xlu1 %v1080_v13  ;;  %v506_v14 = vld [vmem:[%s1317_s2] sm:$0xff]  ;;  %v507_v15 = vld [vmem:[%s1317_s2 + $0x8] sm:$0xff]  ;;  %vm51_vm0 = vcmask 1039360   ;;  %vm77_vm1 = vcmask 1031168  }
  0x17   :  { %889 = vrot.lane.b32.xlu1 %v888_v7, %s1071_s26  ;;  %1018 = vset.pattern.permute.xlu0 %v1080_v13  ;;  %vm103_vm2 = vcmask 900096   ;;  %vm129_vm3 = vcmask 891904   ;;  %vm155_vm4 = vcmask 883712   ;;  %vm181_vm5 = vcmask 752640  }
  0x18   :  { %vm207_vm6 = vcmask 744448   ;;  %vm233_vm7 = vcmask 736256   ;;  %vm518_vm8 = vcmask 588800  }
  0x1a   :  { %884 = vrot.lane.b32.xlu0 %v883_v8, %s1071_s26 }
  0x1b   :  { %894 = vrot.lane.b32.xlu1 %v878_v3, %s1072_s0 }
  0x1e   :  { %899 = vrot.lane.b32.xlu0 %v878_v3, %s1073_s27 }
  0x1f   :  { %904 = vrot.lane.b32.xlu1 %v883_v8, %s1072_s0 }
  0x22   :  { %909 = vrot.lane.b32.xlu0 %v883_v8, %s1073_s27 }
  0x23   :  { %914 = vrot.lane.b32.xlu1 %v888_v7, %s1072_s0 }
  0x26   :  { %919 = vrot.lane.b32.xlu0 %v888_v7, %s1073_s27 }
  0x27   :  { %924 = vrot.lane.b32.xlu1 %v878_v3, %s1074_s28 }
  0x2a   :  { %929 = vrot.lane.b32.xlu0 %v878_v3, %s1075_s29 }
  0x2b   :  { %934 = vrot.lane.b32.xlu1 %v883_v8, %s1074_s28 }
  0x2e   :  { %939 = vrot.lane.b32.xlu0 %v883_v8, %s1075_s29 }
  0x2f   :  { %944 = vrot.lane.b32.xlu1 %v888_v7, %s1074_s28 }
  0x32   :  { %949 = vrot.lane.b32.xlu0 %v888_v7, %s1075_s29 }
  0x33   :  { %954 = vrot.lane.b32.xlu1 %v878_v3, %s1076_s30 }
  0x36   :  { %959 = vrot.lane.b32.xlu0 %v878_v3, %s1077_s4 }
  0x37   :  { %964 = vrot.lane.b32.xlu1 %v883_v8, %s1076_s30 }
  0x3a   :  { %969 = vrot.lane.b32.xlu0 %v883_v8, %s1077_s4 }
  0x3b   :  { %974 = vrot.lane.b32.xlu1 %v888_v7, %s1076_s30 }
  0x3e   :  { %979 = vrot.lane.b32.xlu0 %v888_v7, %s1077_s4 }
  0x3f   :  { %227 = vrot.lane.b32.xlu1 %v1116_v0, %s1078_s5 }
  0x42   :  { %229 = vrot.lane.b32.xlu0 %v1118_v1, %s1078_s5 }
  0x43   :  { %984 = vrot.lane.b32.xlu1 %v983_v11, %s1071_s26 }
  0x46   :  { %433 = vrot.lane.b32.xlu0 %v1124_v5, %s1078_s5 }
  0x47   :  { %435 = vrot.lane.b32.xlu1 %v1126_v6, %s1078_s5 }
  0x4a   :  { %225 = vrot.lane.b32.xlu0 %v1120_v2, %s1078_s5 }
  0x4b   :  { %231 = vrot.lane.b32.xlu1 %v38_v4, %s1078_s5 }
  0x4e   :  { %989 = vrot.lane.b32.xlu0 %v983_v11, %s1072_s0 }
  0x4f   :  { %994 = vrot.lane.b32.xlu1 %v983_v11, %s1073_s27 }
  0x52   :  { %999 = vrot.lane.b32.xlu0 %v983_v11, %s1074_s28 }
  0x53   :  { %1004 = vrot.lane.b32.xlu1 %v983_v11, %s1075_s29 }
  0x56   :  { %1009 = vrot.lane.b32.xlu0 %v983_v11, %s1076_s30 }
  0x57   :  { %1014 = vrot.lane.b32.xlu1 %v983_v11, %s1077_s4 }
  0x5a   :  { %437 = vrot.lane.b32.xlu0 %v1146_v9, %s1078_s5 }
  0x5b   :  { %439 = vrot.lane.b32.xlu1 %v253_v10, %s1078_s5 }
  0x5e   :  { %510 = vperm.xlu0 %1018, %v506_v14  }
  0x5f   :  { %515 = vperm.xlu1 %1019, %v507_v15  }
  0x88   :  { %v880_v16 = vpop.permute.xlu0 %879 }
  0x89   :  { %v882_v17 = vunpack.i.h.bf16 %v880_v16  ;;  %v881_v18 = vunpack.i.l.bf16 %v880_v16  ;;  %v890_v19 = vpop.permute.xlu1 %889 }
  0x8a   :  { %v892_v20 = vunpack.i.h.bf16 %v890_v19  ;;  %v891_v21 = vunpack.i.l.bf16 %v890_v19 }
  0x8b   :  { %v53_v22 = vsel %vm51_vm0, %v881_v18, %v882_v17 }
  0x8c   :  { %v1169_v23 = vpop.permute.xlu0 %884  ;;  %v804_v24 = vpack.c.bf16 %v53_v22, %v1116_v0  ;;  %v52_v25 = vsel %vm51_vm0, %v891_v21, %v881_v18  ;;  %v54_v30 = vsel %vm51_vm0, %v882_v17, %v892_v20 }
  0x8d   :  { %v887_v26 = vunpack.i.h.bf16 %v1169_v23  ;;  %v886_v27 = vunpack.i.l.bf16 %v1169_v23  ;;  %v895_v28 = vpop.permute.xlu1 %894  ;;  %v806_v29 = vpack.c.bf16 %v52_v25, %v1120_v2  ;;  %v822_v39 = vpack.c.bf16 %v54_v30, %v1118_v1 }
  0x8e   :  { %805 = vmatprep.subr.bf16.mxu0 %v804_v24  ;;  %v897_v31 = vunpack.i.h.bf16 %v895_v28  ;;  %v896_v32 = vunpack.i.l.bf16 %v895_v28 }
  0x8f   :  { %807 = vmatpush1.bf16.msra.mxu0 %v806_v29  ;;  %v266_v33 = vsel %vm51_vm0, %v886_v27, %v887_v26 }
  0x90   :  { %v900_v34 = vpop.permute.xlu0 %899  ;;  %v820_v35 = vpack.c.bf16 %v266_v33, %v1124_v5  ;;  %v79_v42 = vsel %vm77_vm1, %v896_v32, %v897_v31 }
  0x91   :  { %v902_v36 = vunpack.i.h.bf16 %v900_v34  ;;  %v901_v37 = vunpack.i.l.bf16 %v900_v34  ;;  %v1181_v38 = vpop.permute.xlu1 %904 }
  0x92   :  { %821 = vmatprep.subr.bf16.mxu1 %v820_v35  ;;  %v907_v40 = vunpack.i.h.bf16 %v1181_v38  ;;  %v906_v41 = vunpack.i.l.bf16 %v1181_v38 }
  0x93   :  { %823 = vmatpush1.bf16.msra.mxu1 %v822_v39  ;;  %v105_v43 = vsel %vm103_vm2, %v901_v37, %v902_v36 }
  0x94   :  { %v1188_v44 = vpop.permute.xlu0 %909  ;;  %v808_v45 = vpack.c.bf16 %v105_v43, %v79_v42  ;;  %v291_v51 = vsel %vm77_vm1, %v906_v41, %v907_v40 }
  0x95   :  { %v912_v46 = vunpack.i.h.bf16 %v1188_v44  ;;  %v911_v47 = vunpack.i.l.bf16 %v1188_v44  ;;  %v915_v48 = vpop.permute.xlu1 %914 }
  0x96   :  { %v917_v49 = vunpack.i.h.bf16 %v915_v48  ;;  %v916_v50 = vunpack.i.l.bf16 %v915_v48  ;;  %809 = vmatprep.subr.bf16.mxu0 %v808_v45 }
  0x97   :  { %v316_v52 = vsel %vm103_vm2, %v911_v47, %v912_v46 }
  0x98   :  { %v920_v53 = vpop.permute.xlu0 %919  ;;  %v824_v54 = vpack.c.bf16 %v316_v52, %v291_v51  ;;  %v78_v58 = vsel %vm77_vm1, %v916_v50, %v896_v32  ;;  %v80_v59 = vsel %vm77_vm1, %v897_v31, %v917_v49 }
  0x99   :  { %v922_v55 = vunpack.i.h.bf16 %v920_v53  ;;  %v921_v56 = vunpack.i.l.bf16 %v920_v53  ;;  %v925_v57 = vpop.permute.xlu1 %924 }
  0x9a   :  { %825 = vmatprep.subr.bf16.mxu1 %v824_v54  ;;  %v927_v60 = vunpack.i.h.bf16 %v925_v57  ;;  %v926_v61 = vunpack.i.l.bf16 %v925_v57 }
  0x9b   :  { %v104_v62 = vsel %vm103_vm2, %v921_v56, %v901_v37  ;;  %v106_v63 = vsel %vm103_vm2, %v902_v36, %v922_v55 }
  0x9c   :  { %v930_v0 = vpop.permute.xlu0 %929  ;;  %v810_v1 = vpack.c.bf16 %v104_v62, %v78_v58  ;;  %v826_v2 = vpack.c.bf16 %v106_v63, %v80_v59  ;;  %v131_v10 = vsel %vm129_vm3, %v926_v61, %v927_v60 }
  0x9d   :  { %v932_v3 = vunpack.i.h.bf16 %v930_v0  ;;  %v931_v4 = vunpack.i.l.bf16 %v930_v0  ;;  %v1202_v5 = vpop.permute.xlu1 %934 }
  0x9e   :  { %811 = vmatpush1.bf16.msra.mxu0 %v810_v1  ;;  %827 = vmatpush1.bf16.msra.mxu1 %v826_v2  ;;  %v937_v7 = vunpack.i.h.bf16 %v1202_v5  ;;  %v936_v8 = vunpack.i.l.bf16 %v1202_v5 }
  0x9f   :  { %v157_v11 = vsel %vm155_vm4, %v931_v4, %v932_v3 }
  0xa0   :  { %v1208_v13 = vpop.permute.xlu0 %939  ;;  %v812_v14 = vpack.c.bf16 %v157_v11, %v131_v10  ;;  %v341_v20 = vsel %vm129_vm3, %v936_v8, %v937_v7 }
  0xa1   :  { %v942_v15 = vunpack.i.h.bf16 %v1208_v13  ;;  %v941_v16 = vunpack.i.l.bf16 %v1208_v13  ;;  %v945_v17 = vpop.permute.xlu1 %944 }
  0xa2   :  { %v947_v18 = vunpack.i.h.bf16 %v945_v17  ;;  %v946_v19 = vunpack.i.l.bf16 %v945_v17  ;;  %813 = vmatprep.subr.bf16.mxu0 %v812_v14 }
  0xa3   :  { %v366_v21 = vsel %vm155_vm4, %v941_v16, %v942_v15 }
  0xa4   :  { %v950_v22 = vpop.permute.xlu0 %949  ;;  %v828_v24 = vpack.c.bf16 %v366_v21, %v341_v20  ;;  %v130_v29 = vsel %vm129_vm3, %v946_v19, %v926_v61  ;;  %v132_v30 = vsel %vm129_vm3, %v927_v60, %v947_v18 }
  0xa5   :  { %v952_v25 = vunpack.i.h.bf16 %v950_v22  ;;  %v951_v27 = vunpack.i.l.bf16 %v950_v22  ;;  %v955_v28 = vpop.permute.xlu1 %954 }
  0xa6   :  { %829 = vmatprep.subr.bf16.mxu1 %v828_v24  ;;  %v957_v31 = vunpack.i.h.bf16 %v955_v28  ;;  %v956_v32 = vunpack.i.l.bf16 %v955_v28  ;;  %v1256_v28 = vld [vmem:[%s1316_s1] sm:$0xff] }
  0xa7   :  { %v156_v33 = vsel %vm155_vm4, %v951_v27, %v931_v4  ;;  %v158_v34 = vsel %vm155_vm4, %v932_v3, %v952_v25 }
  0xa8   :  { %v960_v35 = vpop.permute.xlu0 %959  ;;  %v814_v36 = vpack.c.bf16 %v156_v33, %v130_v29  ;;  %v830_v37 = vpack.c.bf16 %v158_v34, %v132_v30  ;;  %v183_v47 = vsel %vm181_vm5, %v956_v32, %v957_v31 }
  0xa9   :  { %v962_v39 = vunpack.i.h.bf16 %v960_v35  ;;  %v961_v41 = vunpack.i.l.bf16 %v960_v35  ;;  %v1222_v42 = vpop.permute.xlu1 %964 }
  0xaa   :  { %815 = vmatpush1.bf16.msra.mxu0 %v814_v36  ;;  %831 = vmatpush1.bf16.msra.mxu1 %v830_v37  ;;  %v967_v43 = vunpack.i.h.bf16 %v1222_v42  ;;  %v966_v45 = vunpack.i.l.bf16 %v1222_v42 }
  0xab   :  { %v209_v48 = vsel %vm207_vm6, %v961_v41, %v962_v39 }
  0xac   :  { %v1228_v49 = vpop.permute.xlu0 %969  ;;  %v816_v50 = vpack.c.bf16 %v209_v48, %v183_v47  ;;  %v391_v56 = vsel %vm181_vm5, %v966_v45, %v967_v43 }
  0xad   :  { %v972_v51 = vunpack.i.h.bf16 %v1228_v49  ;;  %v971_v52 = vunpack.i.l.bf16 %v1228_v49  ;;  %v975_v53 = vpop.permute.xlu1 %974 }
  0xae   :  { %817 = vmatprep.subr.bf16.mxu0 %v816_v50  ;;  %v977_v54 = vunpack.i.h.bf16 %v975_v53  ;;  %v976_v55 = vunpack.i.l.bf16 %v975_v53 }
  0xaf   :  { %v416_v57 = vsel %vm207_vm6, %v971_v52, %v972_v51 }
  0xb0   :  { %v980_v58 = vpop.permute.xlu0 %979  ;;  %v832_v59 = vpack.c.bf16 %v416_v57, %v391_v56  ;;  %v182_v63 = vsel %vm181_vm5, %v976_v55, %v956_v32  ;;  %v184_v1 = vsel %vm181_vm5, %v957_v31, %v977_v54  ;;  %v451_v32 = vld [vmem:[%s1316_s1 + $0x8] sm:$0xff]  ;;  %s1081_s1 = smov [#allocation6]  }
  0xb1   :  { %v982_v60 = vunpack.i.h.bf16 %v980_v58  ;;  %v981_v61 = vunpack.i.l.bf16 %v980_v58  ;;  %v228_v62 = vpop.permute.xlu1 %227  ;;  %s786_s13 = sshll.u32 %s1081_s1, 4  ;;  %s787_s13 = int_to_ptr.vmem [resolvable:$true] %s786_s13 }
  0xb2   :  { %833 = vmatprep.subr.bf16.mxu1 %v832_v59  ;;  %s1042_s14 = scalar_lea.vmem %s787_s13, 1536  ;;  %p1047_p9 = scmp.lt.s32.totalorder %s787_s13, %s787_s13 }
  0xb3   :  { %v208_v0 = vsel %vm207_vm6, %v981_v61, %v961_v41  ;;  %v210_v2 = vsel %vm207_vm6, %v962_v39, %v982_v60  ;;  %p1043_p8 = scmp.ne.s32.totalorder %s787_s13, %s1042_s14  ;;  %p1048_p10 = scmp.lt.s32.totalorder %s1042_s14, %s1042_s14 }
  0xb4   :  { %v230_v3 = vpop.permute.xlu0 %229  ;;  %v818_v4 = vpack.c.bf16 %v208_v0, %v182_v63  ;;  %v834_v8 = vpack.c.bf16 %v210_v2, %v184_v1 }
  0xb5   :  { %v985_v10 = vpop.permute.xlu1 %984  ;;  %v235_v11 = vsel %vm233_vm7, %v228_v62, %v230_v3  ;;  %p1049_p11 = por %p1048_p10, %p1047_p9 }
  0xb6   :  { %v987_v14 = vunpack.i.h.bf16 %v985_v10  ;;  %v986_v16 = vunpack.i.l.bf16 %v985_v10  ;;  %819 = vmatpush1.bf16.msra.mxu0 %v818_v4  ;;  %835 = vmatpush1.bf16.msra.mxu1 %v834_v8 }
  0xb7   :  { %541 = vmatprep.subr.mxu0 %v235_v11  ;;  %p1050_p12 = pnand %p1049_p11, %p1043_p8 }
  0xb8   :  { %v434_v17 = vpop.permute.xlu0 %433  ;;  %v268_v20 = vsel %vm51_vm0, %v986_v16, %v987_v14  ;;  %v267_v21 = vsel %vm51_vm0, %v887_v26, %v986_v16 }
  0xb9   :  { %v1243_v18 = vpop.permute.xlu1 %435  ;;  %v836_v27 = vpack.c.bf16 %v268_v20, %v1146_v9  ;;  %v838_v30 = vpack.c.bf16 %v267_v21, %v1126_v6 }
  0xba   :  { %v441_v19 = vsel %vm233_vm7, %v434_v17, %v1243_v18 }
  0xbb   :  { %618 = vmatprep.subr.mxu1 %v441_v19 }
  0xbc   :  { %v226_v22 = vpop.permute.xlu0 %225 }
  0xbd   :  { %v232_v24 = vpop.permute.xlu1 %231  ;;  %v234_v25 = vsel %vm233_vm7, %v226_v22, %v228_v62 }
  0xbe   :  { %542 = vmatpush1.msra.mxu0 %v234_v25  ;;  %v236_v29 = vsel %vm233_vm7, %v230_v3, %v232_v24 }
  0xbf   :  { %619 = vmatpush1.msra.mxu1 %v236_v29  ;;  %837 = vmatprep.subr.bf16.mxu0 %v836_v27 }
  0xc0   :  { %852 = vmatprep.subr.bf16.mxu1 %v836_v27  ;;  %v990_v23 = vpop.permute.xlu0 %989  ;;  %798 = vmatmul.mubr.msk.f32.vlgmr.msra.gmra.mrb[0].mxu0 %vm518_vm8, %v1256_v28 }
  0xc1   :  { %v992_v26 = vunpack.i.h.bf16 %v990_v23  ;;  %v991_v9 = vunpack.i.l.bf16 %v990_v23  ;;  %v995_v31 = vpop.permute.xlu1 %994  ;;  %800 = vmatmul.mubr.msk.f32.vlgmr.msra.gmra.mrb[0].mxu1 %vm518_vm8, %v1256_v28  ;;  %839 = vmatpush1.bf16.msra.mxu0 %v838_v30 }
  0xc2   :  { %v997_v33 = vunpack.i.h.bf16 %v995_v31  ;;  %v996_v6 = vunpack.i.l.bf16 %v995_v31  ;;  %857 = vmatpush1.bf16.msra.mxu1 %v838_v30  ;;  %595 = vmatprep.mubr.f32.mxu0 %v1079_v12 }
  0xc3   :  { %v292_v34 = vsel %vm77_vm1, %v907_v40, %v991_v9  ;;  %v293_v35 = vsel %vm77_vm1, %v991_v9, %v992_v26  ;;  %672 = vmatprep.mubr.f32.mxu1 %v1079_v12 }
  0xc4   :  { %v317_v36 = vsel %vm103_vm2, %v912_v46, %v996_v6  ;;  %v1000_v37 = vpop.permute.xlu0 %999  ;;  %v318_v39 = vsel %vm103_vm2, %v996_v6, %v997_v33  ;;  %799 = vmatmul.mubr.msk.f32.gmra.mrb[2].mxu0 %vm518_vm8, %v451_v32 }
  0xc5   :  { %v842_v41 = vpack.c.bf16 %v317_v36, %v292_v34  ;;  %v1002_v45 = vunpack.i.h.bf16 %v1000_v37  ;;  %v1001_v47 = vunpack.i.l.bf16 %v1000_v37  ;;  %v1005_v48 = vpop.permute.xlu1 %1004  ;;  %v840_v38 = vpack.c.bf16 %v318_v39, %v293_v35  ;;  %801 = vmatmul.mubr.msk.f32.gmra.mrb[2].mxu1 %vm518_vm8, %v451_v32  ;;  %743 = vmatprep.mubr.f32.mxu0 %v1079_v12 }
  0xc6   :  { %v1007_v40 = vunpack.i.h.bf16 %v1005_v48  ;;  %v1006_v50 = vunpack.i.l.bf16 %v1005_v48  ;;  %749 = vmatprep.mubr.f32.mxu1 %v1079_v12 }
  0xc7   :  { %v342_v44 = vsel %vm129_vm3, %v937_v7, %v1001_v47  ;;  %841 = vmatprep.subr.bf16.mxu0 %v840_v38  ;;  %853 = vmatprep.subr.bf16.mxu1 %v840_v38  ;;  %v343_v46 = vsel %vm129_vm3, %v1001_v47, %v1002_v45 }
  0xc8   :  { %v367_v52 = vsel %vm155_vm4, %v942_v15, %v1006_v50  ;;  %843 = vmatpush1.bf16.msra.mxu0 %v842_v41  ;;  %858 = vmatpush1.bf16.msra.mxu1 %v842_v41  ;;  %v1010_v53 = vpop.permute.xlu0 %1009  ;;  %v368_v54 = vsel %vm155_vm4, %v1006_v50, %v1007_v40 }
  0xc9   :  { %v846_v55 = vpack.c.bf16 %v367_v52, %v342_v44  ;;  %v1012_v56 = vunpack.i.h.bf16 %v1010_v53  ;;  %v1011_v12 = vunpack.i.l.bf16 %v1010_v53  ;;  %v1015_v57 = vpop.permute.xlu1 %1014  ;;  %v844_v5 = vpack.c.bf16 %v368_v54, %v343_v46 }
  0xca   :  { %v1017_v58 = vunpack.i.h.bf16 %v1015_v57  ;;  %v1016_v7 = vunpack.i.l.bf16 %v1015_v57 }
  0xcb   :  { %v392_v59 = vsel %vm181_vm5, %v967_v43, %v1011_v12  ;;  %845 = vmatprep.subr.bf16.mxu0 %v844_v5  ;;  %854 = vmatprep.subr.bf16.mxu1 %v844_v5  ;;  %v393_v13 = vsel %vm181_vm5, %v1011_v12, %v1012_v56 }
  0xcc   :  { %v417_v15 = vsel %vm207_vm6, %v972_v51, %v1016_v7  ;;  %847 = vmatpush1.bf16.msra.mxu0 %v846_v55  ;;  %859 = vmatpush1.bf16.msra.mxu1 %v846_v55  ;;  %v418_v60 = vsel %vm207_vm6, %v1016_v7, %v1017_v58  ;;  %v438_v62 = vpop.permute.xlu0 %437 }
  0xcd   :  { %v850_v61 = vpack.c.bf16 %v417_v15, %v392_v59  ;;  %v848_v63 = vpack.c.bf16 %v418_v60, %v393_v13  ;;  %v440_v0 = vpop.permute.xlu1 %439  ;;  %v442_v43 = vsel %vm233_vm7, %v1243_v18, %v438_v62 }
  0xce   :  { %v443_v42 = vsel %vm233_vm7, %v438_v62, %v440_v0 }
  0xcf   :  { %849 = vmatprep.subr.bf16.mxu0 %v848_v63  ;;  %855 = vmatprep.subr.bf16.mxu1 %v848_v63 }
  0xd0   :  { %851 = vmatpush1.bf16.msra.mxu0 %v850_v61  ;;  %860 = vmatpush1.bf16.msra.mxu1 %v850_v61 }
  0xd1   :  { %695 = vmatprep.subr.mxu0 %v443_v42  ;;  %856 = vmatprep.subr.mxu1 %v443_v42 }
  0xd4   :  { %696 = vmatpush1.msra.mxu0 %v442_v43  ;;  %861 = vmatpush1.msra.mxu1 %v442_v43 }
  0xd5   :  { %802 = vmatmul.mubr.msk.f32.vlgmr.msra.gmra.mrb[4].mxu0 %vm518_vm8, %v1256_v28  ;;  %803 = vmatmul.mubr.msk.f32.vlgmr.msra.gmra.mrb[4].mxu1 %vm518_vm8, %v451_v32 }
  0xdd   :  { %v511_v49 = vpop.permute.xlu0 %510 }
  0xde   :  { %v516_v11 = vpop.permute.xlu1 %515 }
 0x193   :  { %v591_v51 = vpop.f32.mrb[0].mxu0 }
 0x194   :  { %v668_v1 = vpop.f32.mrb[0].mxu1  ;;  %v592_v2 = vadd.f32 %v591_v51, %v511_v49  ;;  %v593_v3 = vpop.f32.mrb[1].mxu0 }
 0x195   :  { %v669_v4 = vadd.f32 %v668_v1, %v511_v49  ;;  %v594_v8 = vadd.f32 %v593_v3, %v511_v49  ;;  %v670_v10 = vpop.f32.mrb[1].mxu1 }
 0x196   :  { %v756_v14 = vmax.f32 %v592_v2, 0.0  ;;  %v671_v16 = vadd.f32 %v670_v10, %v511_v49 }
 0x197   :  { %v758_v17 = vmax.f32 %v669_v4, 0.0  ;;  %v757_v18 = vmax.f32 %v594_v8, 0.0  ;;  %v597_v19 = vpop.f32.mrb[2].mxu0 }
 0x198   :  { %768 = vst [vmem:[#allocation6] sm:$0xff] %v756_v14  ;;  %v759_v20 = vmax.f32 %v671_v16, 0.0  ;;  %v674_v21 = vpop.f32.mrb[2].mxu1  ;;  %v598_v22 = vadd.f32 %v597_v19, %v516_v11  ;;  %v599_v24 = vpop.f32.mrb[3].mxu0 }
 0x199   :  { %770 = vst [vmem:[#allocation6 + $0x10] sm:$0xff] %v758_v17  ;;  %769 = vst [vmem:[#allocation6 + $0x8] sm:$0xff] %v757_v18  ;;  %v675_v25 = vadd.f32 %v674_v21, %v516_v11  ;;  %v600_v27 = vadd.f32 %v599_v24, %v516_v11  ;;  %v676_v28 = vpop.f32.mrb[3].mxu1 }
 0x19a   :  { %775 = vst [vmem:[#allocation6 + $0x30] sm:$0xff] %v759_v20  ;;  %v762_v29 = vmax.f32 %v598_v22, 0.0  ;;  %v677_v30 = vadd.f32 %v676_v28, %v516_v11 }
 0x19b   :  { %v764_v23 = vmax.f32 %v675_v25, 0.0  ;;  %v763_v26 = vmax.f32 %v600_v27, 0.0 }
 0x19c   :  { %771 = vst [vmem:[#allocation6 + $0x18] sm:$0xff] %v762_v29  ;;  %v765_v9 = vmax.f32 %v677_v30, 0.0 }
 0x19d   :  { %773 = vst [vmem:[#allocation6 + $0x28] sm:$0xff] %v764_v23  ;;  %772 = vst [vmem:[#allocation6 + $0x20] sm:$0xff] %v763_v26 }
 0x19e   :  { %778 = vst [vmem:[#allocation6 + $0x48] sm:$0xff] %v765_v9 }
 0x1a8   :  { %v745_v31 = vpop.f32.mrb[4].mxu0  ;;  %v751_v32 = vpop.f32.mrb[4].mxu1 }
 0x1a9   :  { %v746_v33 = vadd.f32 %v745_v31, %v511_v49  ;;  %v752_v6 = vadd.f32 %v751_v32, %v516_v11  ;;  %v747_v34 = vpop.f32.mrb[5].mxu0  ;;  %v753_v35 = vpop.f32.mrb[5].mxu1 }
 0x1aa   :  { %v748_v36 = vadd.f32 %v747_v34, %v511_v49  ;;  %v754_v37 = vadd.f32 %v753_v35, %v516_v11 }
 0x1ab   :  { %v760_v39 = vmax.f32 %v746_v33, 0.0  ;;  %v766_v41 = vmax.f32 %v752_v6, 0.0 }
 0x1ac   :  { %v761_v45 = vmax.f32 %v748_v36, 0.0  ;;  %v767_v47 = vmax.f32 %v754_v37, 0.0 }
 0x1ad   :  { %776 = vst [vmem:[#allocation6 + $0x38] sm:$0xff] %v760_v39  ;;  %779 = vst [vmem:[#allocation6 + $0x50] sm:$0xff] %v766_v41 }
 0x1ae   :  { %777 = vst [vmem:[#allocation6 + $0x40] sm:$0xff] %v761_v45  ;;  %780 = vst [vmem:[#allocation6 + $0x58] sm:$0xff] %v767_v47 }
 0x1af   :  { %1053 = shalt.err (!%p1050_p12)
}
 0x1b0   :  { %s1054_s17 = scalar_lea.hbm %s1318_s3, 1536 }
 0x1b1   :  { %p1055_p13 = scmp.ne.s32.totalorder %s1318_s3, %s1054_s17  ;;  %p1058_p0 = scmp.lt.u32.totalorder %s1054_s17, %s1318_s3 }
 0x1b3   :  { %p1060_p1 = pnand %p1058_p0, %p1055_p13 }
 0x1b5   :  { %1063 = shalt.err (!%p1060_p1)
}
 0x1b6   :  { %s1082_s22 = smov 384   ;;  %s1083_s23 = smov 24  }
 0x1b7   :  { %792 = dma.vmem_to_hbm [thread:$0]  %s787_s13, 1536, %s1318_s3, [#allocation5], %s1082_s22, %s1082_s22, %s1083_s23  }
 0x1b8   :  { %1066 = dma.done.wait [#allocation5], 1536  }
 0x1b9   :  { %1067 = vsyncadd [#allocation5], 4294965760 }
 0x1ba   :  { %796 = vsyncpa [#allocation4], 1 }
 0x1bb   :  { %797 = vsyncpa [#allocation5], 1 }

</bundles_post_ra>
